<compile_context>
chip_gen: v5e
topology: v5e:2x2
jax: 0.10.0
libtpu: 0.0.40
codegen_flags: <defaults>
</compile_context>

<pallas_src>
import functools

import jax
import jax.numpy as jnp
from jax import lax
from jax.experimental import pallas as pl
from jax.experimental.pallas import tpu as pltpu

_NEG_BIG = -3.0e38  # finite "-inf" sentinel (avoids inf-inf NaN edge cases)


def _divisors_desc(n, cap=None):
    divs = set()
    i = 1
    while i * i <= n:
        if n % i == 0:
            divs.add(i)
            divs.add(n // i)
        i += 1
    out = sorted(divs, reverse=True)
    if cap is not None:
        out = [d for d in out if d <= cap]
    return out


def _vmem_capacity_bytes():
    """Physical VMEM per TensorCore (falls back to the smallest, v7x)."""
    try:
        return int(pltpu.get_tpu_info().vmem_capacity_bytes)
    except Exception:
        return 64 * 1024 * 1024


def _vmem_estimate(bb, tq, tk, tkb, h, in_bytes):
    """Rough per-grid-step VMEM footprint (double-buffered blocks + temps)."""
    qp = 2 * bb * tq * h * in_bytes              # q_proj block (x2 buffers)
    enc = 2 * bb * tkb * h * in_bytes            # enc block (x2 buffers)
    out = 2 * bb * tq * tk * 4                   # resident f32 output block
    scr = 2 * bb * tq * 128 * 4                  # (bb,Tq,1) scratch, lane-padded
    tmp = (3 * bb * tq * tkb + bb * tq * tk) * 4  # scores / exp temporaries
    return qp + enc + out + scr + tmp


def _choose_tiles(B, Tq, Tk, H, in_bytes, budget):
    """Pick (batch block, key block) from an explicit VMEM budget.

    Keeps >= ~4 steps on the (parallel) batch axis when B allows it (DMA
    pipelining + v7x megacore), then tiles the key axis (lane-aligned
    divisors of Tk) only when the untiled block does not fit the budget.
    """
    step_target = min(B, 4)
    bb_cap = max(1, B // step_target)
    key_cands = [d for d in _divisors_desc(Tk) if d % 128 == 0 and d < Tk]
    for bb in _divisors_desc(B, cap=bb_cap):
        if _vmem_estimate(bb, Tq, Tk, Tk, H, in_bytes) <= budget:
            return bb, Tk                         # untiled key axis fits
        for tkb in key_cands:                     # largest lane-aligned first
            if _vmem_estimate(bb, Tq, Tk, tkb, H, in_bytes) <= budget:
                return bb, tkb
    # Best effort (still correct, possibly tight on VMEM).
    return 1, (key_cands[-1] if key_cands else Tk)


def _attn_kernel(qp_ref, enc_ref, out_ref, m_ref, l_ref, *, tkb, nk):
    # qp_ref:  (bb, Tq, H)     pre-projected queries (q @ W), f32 or bf16
    # enc_ref: (bb, tkb, H)    encoder-output key tile, f32 or bf16
    # out_ref: (bb, Tq, Tk)    f32 attention weights (VMEM-resident across k)
    # m_ref/l_ref: (bb, Tq, 1) f32 running max / running sum scratch
    qp = qp_ref[...]
    enc = enc_ref[...]

    # scores[b,q,k] = sum_h qp[b,q,h] * enc[b,k,h]   (A.B^T, MXU-direct,
    # f32 accumulation regardless of operand dtype)
    s = lax.dot_general(
        qp, enc,
        dimension_numbers=(((2,), (2,)), ((0,), (0,))),
        preferred_element_type=jnp.float32)

    if nk == 1:
        # Single key step: direct softmax. exp() goes straight into the
        # output tile and is scaled in place (fewer full-size f32 temps).
        m = jnp.max(s, axis=-1, keepdims=True)
        out_ref[...] = jnp.exp(s - m)
        denom = jnp.sum(out_ref[...], axis=-1, keepdims=True)
        out_ref[...] = out_ref[...] * pl.reciprocal(denom, approx=False)
    else:
        k = pl.program_id(1)

        @pl.when(k == 0)
        def _init():
            m_ref[...] = jnp.full(m_ref.shape, _NEG_BIG, m_ref.dtype)
            l_ref[...] = jnp.zeros(l_ref.shape, l_ref.dtype)

        # Stash raw scores in the resident output tile; only the running
        # max / sum are updated per step, and the whole row is normalized
        # once on the last key step (no per-step rescale of earlier columns).
        start = pl.multiple_of(k * tkb, tkb)
        out_ref[:, :, pl.ds(start, tkb)] = s

        m_prev = m_ref[...]
        m_new = jnp.maximum(m_prev, jnp.max(s, axis=-1, keepdims=True))
        l_ref[...] = (l_ref[...] * jnp.exp(m_prev - m_new)
                      + jnp.sum(jnp.exp(s - m_new), axis=-1, keepdims=True))
        m_ref[...] = m_new

        @pl.when(k == nk - 1)
        def _finalize():
            inv = pl.reciprocal(l_ref[...], approx=False)
            out_ref[...] = jnp.exp(out_ref[...] - m_ref[...]) * inv


def new_attn(this_output, encoder_outputs, weight, bias=None, *,
             matmul_dtype=None, block_b=None, block_k=None):
    """
    this_output:     (B, Tq, H)
    encoder_outputs: (B, Tk, H)
    weight:          (H, H)  PyTorch nn.Linear weight layout (out, in)
    bias:            (H,)    accepted for API parity; provably a no-op under
                             the trailing softmax, so it is not used.
    matmul_dtype:    operand dtype for the score matmul (e.g. jnp.bfloat16 to
                     halve the enc HBM read); softmax math is always f32.
    returns:         (B, Tq, Tk) softmax attention weights (float32)
    """
    B, Tq, H = this_output.shape
    Bk, Tk, Hk = encoder_outputs.shape
    assert Bk == B and Hk == H
    del bias  # per-(b,q) constant along the key axis -> softmax-invariant

    if matmul_dtype is None:
        # Default: keep the callers' dtype (no extra HBM cast pass).
        matmul_dtype = jnp.promote_types(this_output.dtype,
                                         encoder_outputs.dtype)
    matmul_dtype = jnp.dtype(matmul_dtype)

    # Hoist the small q @ W projection out of the kernel (one full-MXU XLA
    # matmul; shorter in-kernel dependency chain, no W BlockSpec / VMEM).
    #   scores = q . (enc @ W^T)^T = (q @ W) . enc^T   (bias cancels in softmax)
    q_proj = jnp.einsum('bqo,oh->bqh', this_output, weight,
                        preferred_element_type=jnp.float32)
    q_proj = q_proj.astype(matmul_dtype)
    enc = encoder_outputs.astype(matmul_dtype)

    # Tile selection from an explicit per-generation VMEM budget.
    phys_vmem = _vmem_capacity_bytes()
    tile_budget = int(phys_vmem * 0.6)      # headroom for compiler temporaries
    vmem_limit = int(phys_vmem * 0.9)
    bb_auto, tkb_auto = _choose_tiles(B, Tq, Tk, H, matmul_dtype.itemsize,
                                      tile_budget)
    bb = block_b if block_b is not None else bb_auto
    tkb = block_k if block_k is not None else tkb_auto
    assert B % bb == 0, "block_b must divide the batch size"
    assert Tk % tkb == 0, "block_k must divide the key length"
    if tkb != Tk:
        assert tkb % 128 == 0, "key tiles must be lane-aligned (x128)"
    nb, nk = B // bb, Tk // tkb

    # TODO(synk): for decode-style Tq < 8, flatten (bb, Tq) into the sublane
    # dim of the q/out blocks to keep stores sublane-dense.

    kernel = functools.partial(_attn_kernel, tkb=tkb, nk=nk)

    return pl.pallas_call(
        kernel,
        out_shape=jax.ShapeDtypeStruct((B, Tq, Tk), jnp.float32),
        grid_spec=pltpu.PrefetchScalarGridSpec(
            num_scalar_prefetch=0,
            grid=(nb, nk),
            in_specs=[
                # q_proj: constant along k -> resident per batch block.
                pl.BlockSpec((bb, Tq, H), lambda b, k: (b, 0, 0)),
                # enc: streamed along the key axis.
                pl.BlockSpec((bb, tkb, H), lambda b, k: (b, k, 0)),
            ],
            # Output block spans the full key axis and ignores k -> it stays
            # VMEM-resident across the key loop (accumulator pattern) and is
            # written back to HBM exactly once per batch block.
            out_specs=pl.BlockSpec((bb, Tq, Tk), lambda b, k: (b, 0, 0)),
            scratch_shapes=[
                pltpu.VMEM((bb, Tq, 1), jnp.float32),   # running max
                pltpu.VMEM((bb, Tq, 1), jnp.float32),   # running sum
            ],
        ),
        compiler_params=pltpu.CompilerParams(
            dimension_semantics=("parallel", "arbitrary"),
            vmem_limit_bytes=vmem_limit,
        ),
    )(q_proj, enc)


def new_attn_ref(this_output, encoder_outputs, weight, bias):
    enc_trans = jnp.einsum('bkh,oh->bko', encoder_outputs, weight) + bias
    scores = jnp.einsum('bqo,bko->bqk', this_output, enc_trans)
    return jax.nn.softmax(scores, axis=2)


if __name__ == "__main__":
    key = jax.random.PRNGKey(0)
    k1, k2, k3, k4 = jax.random.split(key, 4)

    # Small shapes consistent with the module: batch=2, seq=8, hidden=32.
    B, Tq, Tk, H = 2, 8, 8, 32
    this_output = jax.random.normal(k1, (B, Tq, H), dtype=jnp.float32)
    encoder_outputs = jax.random.normal(k2, (B, Tk, H), dtype=jnp.float32)
    bound = 1.0 / (H ** 0.5)
    weight = jax.random.uniform(k3, (H, H), minval=-bound, maxval=bound,
                                dtype=jnp.float32)
    bias = jax.random.uniform(k4, (H,), minval=-bound, maxval=bound,
                              dtype=jnp.float32)

    out = jax.block_until_ready(
        new_attn(this_output, encoder_outputs, weight, bias))
    ref = new_attn_ref(this_output, encoder_outputs, weight, bias)
    assert out.shape == (B, Tq, Tk)
    assert bool(jnp.allclose(out, ref, atol=1e-4, rtol=1e-4)), "f32 mismatch"

    # Exercise the tiled-key online-softmax path (grid = (2, 2)) in f32.
    Tk2 = 256
    enc2 = jax.random.normal(k4, (B, Tk2, H), dtype=jnp.float32)
    out2 = jax.block_until_ready(
        new_attn(this_output, enc2, weight, bias, block_k=128))
    ref2 = new_attn_ref(this_output, enc2, weight, bias)
    assert out2.shape == (B, Tq, Tk2)
    assert bool(jnp.allclose(out2, ref2, atol=5e-4, rtol=5e-4)), \
        "tiled-key mismatch"

    # Exercise the bf16 matmul-operand path (looser tolerance vs f32 ref).
    out3 = jax.block_until_ready(
        new_attn(this_output, enc2, weight, bias,
                 matmul_dtype=jnp.bfloat16, block_k=128))
    assert bool(jnp.allclose(out3, ref2, atol=2e-2, rtol=2e-2)), \
        "bf16 mismatch"

    print("KERNEL_OK")
</pallas_src>

<mosaic_0001>
module attributes {stable_mosaic.version = 11 : i64} {
  func.func @_attn_kernel(%arg0: i32, %arg1: i32, %arg2: memref<1x8x32xf32, #tpu.memory_space<vmem>>, %arg3: memref<1x8x32xf32, #tpu.memory_space<vmem>>, %arg4: memref<1x8x8xf32, #tpu.memory_space<vmem>>, %arg5: memref<1x8x1xf32, #tpu.memory_space<vmem>>, %arg6: memref<1x8x1xf32, #tpu.memory_space<vmem>>) attributes {dimension_semantics = [#tpu.dimension_semantics<parallel>, #tpu.dimension_semantics<arbitrary>], iteration_bounds = array<i64: 2, 1>, scalar_prefetch = 0 : i64, scratch_operands = 2 : i64, tpu.core_type = #tpu.core_type<tc>, window_params = [{transform_indices = @transform_0, window_bounds = array<i64: 1, 8, 32>}, {transform_indices = @transform_1, window_bounds = array<i64: 1, 8, 32>}, {transform_indices = @transform_2, window_bounds = array<i64: 1, 8, 8>}]} {
    %c0 = arith.constant 0 : index
    %c0_0 = arith.constant 0 : index
    %c0_1 = arith.constant 0 : index
    %0 = vector.load %arg2[%c0, %c0_0, %c0_1] : memref<1x8x32xf32, #tpu.memory_space<vmem>>, vector<1x8x32xf32>
    %c0_2 = arith.constant 0 : index
    %c0_3 = arith.constant 0 : index
    %c0_4 = arith.constant 0 : index
    %1 = vector.load %arg3[%c0_2, %c0_3, %c0_4] : memref<1x8x32xf32, #tpu.memory_space<vmem>>, vector<1x8x32xf32>
    %cst = arith.constant dense<0.000000e+00> : vector<1x8x8xf32>
    %2 = tpu.matmul %0, %1, %cst {dimension_numbers = #tpu.dot_dimension_numbers<[2], [2], [1], [1], [0, 0, 0, 1, 1, 1], [0], [0]>} : vector<1x8x32xf32>, vector<1x8x32xf32>, vector<1x8x8xf32> -> vector<1x8x8xf32>
    %cst_5 = arith.constant dense<0xFF800000> : vector<1x8xf32>
    %3 = vector.multi_reduction <maximumf>, %2, %cst_5 [2] : vector<1x8x8xf32> to vector<1x8xf32>
    %4 = vector.shape_cast %3 : vector<1x8xf32> to vector<1x8x1xf32>
    %5 = vector.broadcast %4 : vector<1x8x1xf32> to vector<1x8x8xf32>
    %6 = arith.subf %2, %5 : vector<1x8x8xf32>
    %7 = math.exp %6 : vector<1x8x8xf32>
    %c0_6 = arith.constant 0 : index
    %c0_7 = arith.constant 0 : index
    %c0_8 = arith.constant 0 : index
    %8 = vector.load %arg4[%c0_6, %c0_7, %c0_8] : memref<1x8x8xf32, #tpu.memory_space<vmem>>, vector<1x8x8xf32>
    tpu.vector_store %arg4[%c0_6, %c0_7, %c0_8], %7 {strides = array<i32>} : memref<1x8x8xf32, #tpu.memory_space<vmem>>, vector<1x8x8xf32>,
    %c0_9 = arith.constant 0 : index
    %c0_10 = arith.constant 0 : index
    %c0_11 = arith.constant 0 : index
    %9 = vector.load %arg4[%c0_9, %c0_10, %c0_11] : memref<1x8x8xf32, #tpu.memory_space<vmem>>, vector<1x8x8xf32>
    %cst_12 = arith.constant dense<0.000000e+00> : vector<1x8xf32>
    %10 = vector.multi_reduction <add>, %9, %cst_12 [2] : vector<1x8x8xf32> to vector<1x8xf32>
    %11 = vector.shape_cast %10 : vector<1x8xf32> to vector<1x8x1xf32>
    %c0_13 = arith.constant 0 : index
    %c0_14 = arith.constant 0 : index
    %c0_15 = arith.constant 0 : index
    %12 = vector.load %arg4[%c0_13, %c0_14, %c0_15] : memref<1x8x8xf32, #tpu.memory_space<vmem>>, vector<1x8x8xf32>
    %13 = tpu.reciprocal %11 : vector<1x8x1xf32> -> vector<1x8x1xf32>
    %14 = vector.broadcast %13 : vector<1x8x1xf32> to vector<1x8x8xf32>
    %15 = arith.mulf %12, %14 : vector<1x8x8xf32>
    %c0_16 = arith.constant 0 : index
    %c0_17 = arith.constant 0 : index
    %c0_18 = arith.constant 0 : index
    %16 = vector.load %arg4[%c0_16, %c0_17, %c0_18] : memref<1x8x8xf32, #tpu.memory_space<vmem>>, vector<1x8x8xf32>
    tpu.vector_store %arg4[%c0_16, %c0_17, %c0_18], %15 {strides = array<i32>} : memref<1x8x8xf32, #tpu.memory_space<vmem>>, vector<1x8x8xf32>,
    return
  }
  func.func @transform_0(%arg0: i32, %arg1: i32) -> (i32, i32, i32) {
    %c0_i32 = arith.constant 0 : i32
    %c0_i32_0 = arith.constant 0 : i32
    %c0_i32_1 = arith.constant 0 : i32
    return %arg0, %c0_i32, %c0_i32_0 : i32, i32, i32
  }
  func.func @transform_1(%arg0: i32, %arg1: i32) -> (i32, i32, i32) {
    %c0_i32 = arith.constant 0 : i32
    %c0_i32_0 = arith.constant 0 : i32
    return %arg0, %arg1, %c0_i32 : i32, i32, i32
  }
  func.func @transform_2(%arg0: i32, %arg1: i32) -> (i32, i32, i32) {
    %c0_i32 = arith.constant 0 : i32
    %c0_i32_0 = arith.constant 0 : i32
    %c0_i32_1 = arith.constant 0 : i32
    return %arg0, %c0_i32, %c0_i32_0 : i32, i32, i32
  }
}

</mosaic_0001>

<bundles_post_ra>
// kernel: tpu_custom_call.1
= control target key start
LH: loop header
LB: loop body
LE: loop exit
PB: predicated region body
PF: predicated region fallthrough
CT: control target
= control target key end

     0   :  { %7 = vsyncpa [#allocation5], 0  ;;  %s771_s0 = inlined_call_operand.hbm [shape: f32[2,8,32], index: 0, kind: input, shape index: {}]   ;;  %s772_s1 = inlined_call_operand.hbm [shape: f32[2,8,32], index: 1, kind: input, shape index: {}]   ;;  %s773_s2 = inlined_call_operand.hbm [shape: f32[2,8,8], index: 2, kind: output, shape index: {}]  }
   0x1   :  { %9 = vsyncpa [#allocation5 + $0x1], 0 }
   0x2   :  { %10 = vsyncpa [#allocation8], 0 }
   0x3   :  { %12 = vsyncpa [#allocation8 + $0x1], 0 }
   0x4   :  { %13 = vsyncpa [#allocation6], 0 }
   0x5   :  { %15 = vsyncpa [#allocation6 + $0x1], 0  ;;  %s639_s9 = smov 0   ;;  %s641_s10 = smov 0  }
   0x6   :  { %s643_s11 = smov 0   ;;  %s645_s12 = smov 0  }
   0x7   :  { %s647_s13 = smov 0   ;;  %s649_s14 = smov 0  }
   0x8 LB: > { %s387_s15 = sadd.s32 4294967295, %s622_s14   ;;  %s388_s16 = sadd.s32 4294967294, %s622_s14   ;;  %s622_s14 = sphi %s649_s14, %s21_s14   ;;  %s618_s13 = sphi %s647_s13, %s782_s13   ;;  %s614_s12 = sphi %s645_s12, %s781_s12   ;;  %s610_s11 = sphi %s643_s11, %s780_s11   ;;  %s606_s10 = sphi %s641_s10, %s779_s10   ;;  %s602_s9 = sphi %s639_s9, %s778_s9  }
   0x9   : > { %s33_s17 = sadd.s32 1, %s618_s13  ;;  %s40_s18 = sadd.s32 1, %s610_s11 }
   0xa   : > { %p35_p0 = scmp.ge.s32.totalorder %s33_s17, 2  ;;  %p47_p1 = scmp.ne.s32.totalorder %s610_s11, %s606_s10 }
   0xb   : > { %p48_p2 = scmp.eq.s32.totalorder %s622_s14, 0  ;;  %p53_p3 = scmp.ne.s32.totalorder %s606_s10, %s602_s9 }
   0xc   : > { %s784_s17 = smov (%p35_p0, %s33_s17), 0  ;;  %p54_p5 = scmp.eq.s32.totalorder %s387_s15, 0 }
   0xd   : > { %p680_p4 = por %p48_p2, %p47_p1  ;;  %s37_s20 = ssub.s32 %s618_s13, %s784_s17 }
   0xe   : > { %p105_p6 = scmp.eq.s32.totalorder %s387_s15, 1  ;;  %p38_p7 = scmp.eq.s32.totalorder %s37_s20, 0 }
   0xf   : > { %p686_p8 = por %p54_p5, %p53_p3  ;;  %p111_p10 = scmp.eq.s32.totalorder %s388_s16, 1 }
  0x10   : > { %p690_p9 = por %p105_p6, %p47_p1  ;;  %p390_p12 = scmp.ge.s32.totalorder %s622_s14, 2 }
  0x11   : > { %s695_s23 = scalar_select %p38_p7, %s610_s11, %s40_s18  }
  0x12   : > { %p697_p11 = por %p111_p10, %p53_p3  ;;  %p422_p13 = scmp.lt.s32.totalorder %s622_s14, 2 }
  0x13   : > { %s131_s25 = sand.u32 1, %s610_s11   ;;  %s392_s27 = sshll.u32 %s618_s13, 3 }
  0x14   : > { %s391_s26 = sshll.u32 %s131_s25, 3  ;;  %s139_s30 = scalar_lea.hbm %s771_s0, %s392_s27 }
  0x15   : > { %s135_s3 = scalar_lea.vmem [#allocation4], %s391_s26  ;;  %s141_s5 = sshll.u32 %s139_s30, 4  ;;  %s142_s5 = int_to_ptr.hbm [resolvable:$true] %s141_s5 }
  0x16   : > { %s143_s4 = sshll.u32 %s135_s3, 4  ;;  %p412_p0 = pnand %p422_p13, %p680_p4  ;;  %s144_s4 = int_to_ptr.vmem [resolvable:$true] %s143_s4 }
  0x17   : > { %p395_p1 = scmp.ge.s32.totalorder %s622_s14, 1  ;;  %p168_p2 = scmp.lt.s32.totalorder %s622_s14, 3 }
  0x18   : > { %s132_s6 = scalar_lea.sflag [#allocation5], %s131_s25  ;;  %s159_s15 = scalar_lea.hbm %s772_s1, %s392_s27 }
  0x19   : > { %414 = dma.hbm_to_vmem [thread:$0]  (!%p412_p0), %s142_s5, 128, %s144_s4, %s132_s6  }
  0x1a   : > { %p169_p3 = pnand %p395_p1, %p168_p2  ;;  %s154_s16 = scalar_lea.vmem [#allocation7], %s391_s26 }
  0x1b   : > { %s163_s18 = sshll.u32 %s154_s16, 4  ;;  %s161_s20 = sshll.u32 %s159_s15, 4  ;;  %s164_s18 = int_to_ptr.vmem [resolvable:$true] %s163_s18  ;;  %s162_s20 = int_to_ptr.hbm [resolvable:$true] %s161_s20 }
  0x1c   : > { %s151_s28 = scalar_lea.sflag [#allocation8], %s131_s25  ;;  %172 = sbr.rel (%p169_p3) target bundleno = 441 (0x1b9), region = 28 }
  0x1d   : > { %417 = dma.hbm_to_vmem [thread:$0]  (!%p412_p0), %s162_s20, 128, %s164_s18, %s151_s28  }
  0x1e   : > { %s716_s19 = sand.u32 (!%p169_p3), 1, %s606_s10  }
  0x1f   : > { %s396_s29 = sshll.u32 (!%p169_p3), %s716_s19, 3  ;;  %s175_s30 = scalar_lea.sflag (!%p169_p3), [#allocation5], %s716_s19 }
  0x20   : > { %s178_s3 = scalar_lea.vmem (!%p169_p3), [#allocation4], %s396_s29 }
  0x21   : > { %589 = dma.done.wait (%p686_p8), %s175_s30, 128  }
  0x22   : > { %591 = vsyncadd (%p686_p8), %s175_s30, 4294967168  ;;  %s185_s26 = scalar_lea.sflag [#allocation8], %s716_s19  ;;  %s188_s25 = scalar_lea.vmem [#allocation7], %s396_s29 }
  0x23   : > { %593 = dma.done.wait (%p686_p8), %s185_s26, 128  }
  0x24   : > { %595 = vsyncadd (%p686_p8), %s185_s26, 4294967168  ;;  %vm217_vm0 = vcmask 261120   ;;  %v216_v0 = vld [vmem:[%s188_s25] sm:$0xff]  ;;  %v215_v1 = vld [vmem:[%s178_s3] sm:$0xff]  ;;  %vm244_vm1 = vcmask 64512   ;;  %s214_s27 = scalar_lea.vmem [#allocation9], %s396_s29 }
  0x25   : > { %399 = vmatpush.xpose.msk.msra.mxu0 %vm217_vm0, %v216_v0  ;;  %s402_s21 = sshll.u32 %s614_s12, 3  ;;  %s285_s7 = sshll.u32 %s214_s27, 4  ;;  %s286_s7 = int_to_ptr.vmem [resolvable:$true] %s285_s7 }
  0x26   : > { %s283_s6 = scalar_lea.hbm %s773_s2, %s402_s21  ;;  %s273_s12 = scalar_lea.sflag [#allocation6], %s716_s19 }
  0x27   : > { %s287_s8 = sshll.u32 %s283_s6, 4  ;;  %s556_s28 = scalar_lea.hbm %s773_s2, 16  ;;  %s288_s8 = int_to_ptr.hbm [resolvable:$true] %s287_s8 }
  0x28   : > { %400 = vmatmul.msk.f32.vlgmr.msra.gmra.mxu0 %vm217_vm0, %v215_v1  ;;  %s550_s15 = sshra.s32 %s288_s8, 4  ;;  %s551_s15 = int_to_ptr.hbm [resolvable:$true] %s550_s15 }
  0x29   : > { %s552_s16 = scalar_lea.hbm %s551_s15, 8  ;;  %p557_p7 = scmp.lt.s32.totalorder %s551_s15, %s773_s2 }
  0x2a   : > { %p553_p4 = scmp.ne.s32.totalorder %s551_s15, %s552_s16  ;;  %p558_p8 = scmp.lt.s32.totalorder %s556_s28, %s552_s16 }
  0x2c   : > { %p554_p5 = pnand %p553_p4, %p690_p9  ;;  %p559_p10 = por %p558_p8, %p557_p7 }
  0x2e   : > { %p555_p6 = pneg %p554_p5 }
  0x30   : > { %p560_p13 = pnand %p559_p10, %p555_p6 }
  0xa5   : > { %v241_v2 = vpop.f32.mrf.mxu0 }
  0xa6   : > { %v245_v3 = vsel %vm244_vm1, %v241_v2, -inf }
  0xa7   : > { %246 = vmax.xlane.f32.xlu0 %v245_v3 }
 0x11a   : > { %v247_v4 = vpop.xlane.xlu0 %246 }
 0x11b   : > { %v248_v5 = vsub.f32 %v241_v2, %v247_v4 }
 0x11d   : > { %v249_v6 = vmul.f32 1.442695, %v248_v5 }
 0x11f   : > { %472 = vpow2.f32 %v249_v6 }
 0x125   : > { %v473_v7 = vpop.eup %472 }
 0x126   : > { %251 = vst.msk [vmem:[%s214_s27] sm:$0xff] %vm244_vm1, %v473_v7 }
 0x12d   : > { %v252_v8 = vld [vmem:[%s214_s27] sm:$0xff] }
 0x12e   : > { %v253_v9 = vsel %vm244_vm1, %v252_v8, 0.0 }
 0x12f   : > { %254 = vadd.xlane.f32.xlu0 %v253_v9 }
 0x1a2   : > { %v255_v10 = vpop.xlane.xlu0 %254 }
 0x1a3   : > { %474 = vrcp.f32 %v255_v10  ;;  %v267_v14 = vand.u32 2147483648, %v255_v10  ;;  %v265_v16 = vand.u32 2147483647, %v255_v10  ;;  %vm261_vm3 = vweird.f32 %v255_v10 }
 0x1a5   : > { %v268_v18 = vor.u32 1.1754944e-38, %v267_v14  ;;  %vm266_vm5 = vcmp.eq.f32.partialorder %v265_v16, 8.507059e+37 }
 0x1a9   : > { %v475_v11 = vpop.eup %474 }
 0x1aa   : > { %v257_v12 = vmul.f32 %v475_v11, %v255_v10  ;;  %vm262_vm2 = vweird.f32 %v475_v11 }
 0x1ab   : > { %vm263_vm4 = vmor %vm261_vm3, %vm262_vm2 }
 0x1ac   : > { %v258_v13 = vsub.f32 1.0, %v257_v12 }
 0x1ae   : > { %v259_v15 = vmul.f32 %v475_v11, %v258_v13 }
 0x1b0   : > { %v260_v17 = vadd.f32 %v475_v11, %v259_v15 }
 0x1b2   : > { %v264_v19 = vsel %vm263_vm4, %v475_v11, %v260_v17 }
 0x1b3   : > { %v269_v20 = vsel %vm266_vm5, %v268_v18, %v264_v19 }
 0x1b4   : > { %v270_v21 = vmul.f32 %v269_v20, %v252_v8 }
 0x1b6   : > { %271 = vst.msk [vmem:[%s214_s27] sm:$0xff] %vm244_vm1, %v270_v21 }
 0x1b7   : > { %563 = shalt.err (!%p560_p13)
}
 0x1b8   : > { %409 = dma.vmem_to_hbm [thread:$0]  (%p690_p9), %s286_s7, 128, %s288_s8, %s273_s12  }
 0x1b9 PF: > { %s299_s19 = sand.u32 1, %s602_s9   ;;  %p419_p0 = pnand %p390_p12, %p697_p11 }
 0x1ba   : > { %s300_s3 = scalar_lea.sflag [#allocation6], %s299_s19 }
 0x1bb   : > { %p420_p1 = pneg %p419_p0 }
 0x1bd   : > { %597 = dma.done.wait (%p420_p1), %s300_s3, 128  }
 0x1be   : > { %599 = vsyncadd (%p420_p1), %s300_s3, 4294967168  ;;  %s21_s14 = sadd.s32 1, %s622_s14   ;;  %s778_s9 = smov %s606_s10 }
 0x1bf   : > { %p18_p2 = scmp.ge.s32.totalorder %s21_s14, 4   ;;  %s779_s10 = smov %s610_s11 }
 0x1c0   : > { %s780_s11 = smov %s695_s23  ;;  %s781_s12 = smov %s618_s13 }
 0x1c1   : > { %s782_s13 = smov %s784_s17  ;;  %20 = sbr.rel (!%p18_p2) target bundleno = 8 (0x8), region = 86 }
 0x1c6   :  { %306 = vsyncpa [#allocation5], 1 }
 0x1c7   :  { %308 = vsyncpa [#allocation5 + $0x1], 1 }
 0x1c8   :  { %309 = vsyncpa [#allocation8], 1 }
 0x1c9   :  { %311 = vsyncpa [#allocation8 + $0x1], 1 }
 0x1ca   :  { %312 = vsyncpa [#allocation6], 1 }
 0x1cb   :  { %314 = vsyncpa [#allocation6 + $0x1], 1 }

</bundles_post_ra>
